<compile_context>
chip_gen: v5e
topology: v5e:2x2
jax: 0.10.0
libtpu: 0.0.40
codegen_flags: <defaults>
</compile_context>

<pallas_src>
import jax
import jax.numpy as jnp
from jax.experimental import pallas as pl
from jax.experimental.pallas import tpu as pltpu


_F_IN = 60                 # logical input features (kept unpadded)
_H1, _H2, _H3 = 64, 32, 16
_LANE = 128


def _mlp_kernel(x_ref,
                w1_ref, b1_ref,
                w2_ref, b2_ref,
                w3_ref, b3_ref,
                w4t_ref, b4_ref,
                o_ref):
    """Whole 4-layer MLP fused: 4 MXU matmuls + f32 VPU bias/ReLU + EUP sigmoid.

    x_ref:   [tile, 60] f32 batch tile (unpadded; ragged edge rows hold junk and
             are sliced off by the wrapper -- rows are fully independent).
    w*_ref:  replicated bf16 weights stored [in, out]; b*_ref are f32 biases.
    w4t_ref: [1, 16] bf16 final-layer weight, pre-transposed.
    o_ref:   [1, tile] lane-dense f32 output block (unmasked vst stores).
    """
    # bf16 matmul inputs (MXU fast path); f32 accumulation and f32 elementwise
    # (bias add / ReLU / sigmoid) -- v5e's VPU/EUP have no bf16.
    x = x_ref[...].astype(jnp.bfloat16)
    h = jnp.dot(x, w1_ref[...], preferred_element_type=jnp.float32) + b1_ref[...]
    h = jnp.maximum(h, 0.0).astype(jnp.bfloat16)
    h = jnp.dot(h, w2_ref[...], preferred_element_type=jnp.float32) + b2_ref[...]
    h = jnp.maximum(h, 0.0).astype(jnp.bfloat16)
    h = jnp.dot(h, w3_ref[...], preferred_element_type=jnp.float32) + b3_ref[...]
    h = jnp.maximum(h, 0.0).astype(jnp.bfloat16)
    # Final 16 -> 1 layer folded into the lane-dense output rewrite:
    # [1,16] contracted with [tile,16] on the 16-dim -> [1, tile], so the result
    # is already lane-major and the store below is a dense vst (no [tile,1]
    # masked partial stores).
    # TODO(synk): confirm in the bundle dump that this contraction does not put
    # an un-hidden XLU transpose of h on the critical path; if it does, move to
    # a feature-major ([F, tile]) kernel orientation.
    z = jax.lax.dot_general(w4t_ref[...], h, (((1,), (1,)), ((), ())),
                            preferred_element_type=jnp.float32)
    z = z + b4_ref[...]                       # [1,1] f32 broadcast over lanes
    o_ref[...] = jax.nn.sigmoid(z)            # [1, tile], EUP exp, f32


def _round_up(n, m):
    return ((n + m - 1) // m) * m


def _choose_tile(batch, batch_tile):
    """Batch tile: large enough to amortize the ~0.35us/step overhead, but
    capped at ~half the batch so mid/large batches always produce >=2 grid
    steps and v7x's two TensorCores both get work on the 'parallel' axis."""
    half = _round_up(max(1, (batch + 1) // 2), 128)
    return max(128, min(batch_tile, half))


def _vmem_limit_bytes(tile):
    """Explicit VMEM budget; counts the 128-lane-padded footprints."""
    f32, bf16 = 4, 2
    x_bufs = 2 * tile * _LANE * f32      # double-buffered f32 x block (60 lanes pad to 128)
    o_bufs = 2 * tile * f32              # double-buffered [1, tile] output block
    w_bufs = 512 * 1024                  # replicated weights/biases, (8,128)-padded, x2 buffers
    # Live intermediates, all lane-padded to 128: bf16 matmul inputs (x, h1, h2, h3)
    # plus f32 pre-ReLU activations (h1, h2, h3).
    inters = tile * _LANE * (4 * bf16 + 3 * f32)
    total = x_bufs + o_bufs + w_bufs + inters
    # 1.5x headroom, clamped to stay safe on v7x (64 MiB physical VMEM).
    return int(min(max(int(1.5 * total), 8 * 1024 * 1024), 40 * 1024 * 1024))


def model_estimate_board_forward(x, params, *, batch_tile=4096):
    """Forward pass of ModelEstimateBoard.

    x: [B, 60] float32
    params: dict with w1[60,64], b1[1,64], w2[64,32], b2[1,32],
                      w3[32,16], b3[1,16], w4[16,1],  b4[1,1]  (all f32)
    returns: [B, 1] float32 in (0, 1)
    """
    assert batch_tile % 128 == 0, "batch_tile must be a multiple of 128"
    B, f_in = x.shape
    assert f_in == _F_IN

    tile = _choose_tile(B, batch_tile)
    num_tiles = pl.cdiv(B, tile)
    b_pad = num_tiles * tile                 # output-only padding (4 B/row, tiny)

    # x is passed UNPADDED: no extra HBM pad pass.  The ragged last batch block
    # is handled by Pallas edge-block DMA; out-of-range rows produce junk that
    # is never read back (sliced off below).
    x = x.astype(jnp.float32)

    # Weights -> bf16 once at trace time (tiny arrays); biases stay f32 so the
    # bias-add / ReLU / sigmoid path is f32 on every chip.
    w1 = params["w1"].astype(jnp.bfloat16)
    w2 = params["w2"].astype(jnp.bfloat16)
    w3 = params["w3"].astype(jnp.bfloat16)
    w4t = params["w4"].T.astype(jnp.bfloat16)     # [1, 16]
    b1, b2, b3, b4 = (params[k].astype(jnp.float32) for k in ("b1", "b2", "b3", "b4"))

    def _full(arr):
        # Replicated operand: one block == whole (tiny) array.  Constant
        # index_map -> fetched once; default double-buffering only costs a few
        # hundred KiB, so it is left as-is.
        return pl.BlockSpec(arr.shape, lambda i: (0, 0))

    flops = 2 * b_pad * (_F_IN * _H1 + _H1 * _H2 + _H2 * _H3 + _H3)
    bytes_accessed = (B * _F_IN * 4 + b_pad * 4
                      + 2 * sum(int(v.size) for v in (w1, w2, w3, w4t))
                      + 4 * sum(int(v.size) for v in (b1, b2, b3, b4)))

    out = pl.pallas_call(
        _mlp_kernel,
        out_shape=jax.ShapeDtypeStruct((1, b_pad), jnp.float32),
        grid_spec=pltpu.PrefetchScalarGridSpec(
            num_scalar_prefetch=0,
            grid=(num_tiles,),
            in_specs=[
                pl.BlockSpec((tile, _F_IN), lambda i: (i, 0)),   # unpadded x tile
                _full(w1), _full(b1),
                _full(w2), _full(b2),
                _full(w3), _full(b3),
                _full(w4t), _full(b4),
            ],
            out_specs=pl.BlockSpec((1, tile), lambda i: (0, i)),  # lane-dense
        ),
        compiler_params=pltpu.CompilerParams(
            dimension_semantics=("parallel",),
            vmem_limit_bytes=_vmem_limit_bytes(tile),
        ),
        cost_estimate=pl.CostEstimate(
            flops=flops,
            transcendentals=b_pad,            # one exp per sigmoid output
            bytes_accessed=bytes_accessed,
        ),
    )(x, w1, b1, w2, b2, w3, b3, w4t, b4)

    return out.reshape(b_pad, 1)[:B]


def init_params(key):
    """Deterministic parameter init matching nn.Linear shapes.

    PyTorch stores Linear weight as [out, in]; we store the transpose [in, out]
    so the kernel computes x @ W + b (same math).
    """
    dims = [(60, 64), (64, 32), (32, 16), (16, 1)]
    params = {}
    for idx, (fan_in, fan_out) in enumerate(dims, start=1):
        key, kw, kb = jax.random.split(key, 3)
        bound = 1.0 / (fan_in ** 0.5)  # PyTorch default uniform(-1/sqrt(in), 1/sqrt(in))
        params[f"w{idx}"] = jax.random.uniform(kw, (fan_in, fan_out), jnp.float32, -bound, bound)
        params[f"b{idx}"] = jax.random.uniform(kb, (1, fan_out), jnp.float32, -bound, bound)
    return params


def _reference_forward(x, params):
    h = jnp.maximum(x @ params["w1"] + params["b1"], 0.0)
    h = jnp.maximum(h @ params["w2"] + params["b2"], 0.0)
    h = jnp.maximum(h @ params["w3"] + params["b3"], 0.0)
    return jax.nn.sigmoid(h @ params["w4"] + params["b4"])


if __name__ == "__main__":
    key = jax.random.PRNGKey(0)
    key, kx1, kx2 = jax.random.split(key, 3)
    params = init_params(key)

    # bf16 matmul inputs (f32 accumulation) loosen the match vs the pure-f32
    # reference from 1e-5 to ~1e-3; use a 1e-2 tolerance with margin.
    TOL = 1e-2

    # Small check (B=8): single grid step, exercises the ragged (partial) batch block.
    x_small = jax.random.normal(kx1, (8, 60), jnp.float32)
    out_small = jax.block_until_ready(model_estimate_board_forward(x_small, params))
    ref_small = _reference_forward(x_small, params)
    assert out_small.shape == (8, 1)
    assert jnp.allclose(out_small, ref_small, atol=TOL, rtol=TOL), \
        "mismatch vs pure-JAX reference (B=8)"

    # Multi-tile check (B=300 -> tile=256, 2 pipelined grid steps + ragged last block).
    x_big = jax.random.normal(kx2, (300, 60), jnp.float32)
    out_big = jax.block_until_ready(model_estimate_board_forward(x_big, params))
    ref_big = _reference_forward(x_big, params)
    assert out_big.shape == (300, 1)
    assert jnp.allclose(out_big, ref_big, atol=TOL, rtol=TOL), \
        "mismatch vs pure-JAX reference (B=300)"

    print("KERNEL_OK")
</pallas_src>

<mosaic_0001>
module attributes {stable_mosaic.version = 11 : i64} {
  func.func @_mlp_kernel(%arg0: i32, %arg1: memref<128x60xf32, #tpu.memory_space<vmem>>, %arg2: memref<60x64xbf16, #tpu.memory_space<vmem>>, %arg3: memref<1x64xf32, #tpu.memory_space<vmem>>, %arg4: memref<64x32xbf16, #tpu.memory_space<vmem>>, %arg5: memref<1x32xf32, #tpu.memory_space<vmem>>, %arg6: memref<32x16xbf16, #tpu.memory_space<vmem>>, %arg7: memref<1x16xf32, #tpu.memory_space<vmem>>, %arg8: memref<1x16xbf16, #tpu.memory_space<vmem>>, %arg9: memref<1x1xf32, #tpu.memory_space<vmem>>, %arg10: memref<1x128xf32, #tpu.memory_space<vmem>>) attributes {dimension_semantics = [#tpu.dimension_semantics<parallel>], iteration_bounds = array<i64: 1>, scalar_prefetch = 0 : i64, scratch_operands = 0 : i64, tpu.core_type = #tpu.core_type<tc>, window_params = [{transform_indices = @transform_0, window_bounds = array<i64: 128, 60>}, {pipeline_mode = #tpu.pipeline_mode<synchronous>, transform_indices = @transform_1, window_bounds = array<i64: 60, 64>}, {pipeline_mode = #tpu.pipeline_mode<synchronous>, transform_indices = @transform_2, window_bounds = array<i64: 1, 64>}, {pipeline_mode = #tpu.pipeline_mode<synchronous>, transform_indices = @transform_3, window_bounds = array<i64: 64, 32>}, {pipeline_mode = #tpu.pipeline_mode<synchronous>, transform_indices = @transform_4, window_bounds = array<i64: 1, 32>}, {pipeline_mode = #tpu.pipeline_mode<synchronous>, transform_indices = @transform_5, window_bounds = array<i64: 32, 16>}, {pipeline_mode = #tpu.pipeline_mode<synchronous>, transform_indices = @transform_6, window_bounds = array<i64: 1, 16>}, {pipeline_mode = #tpu.pipeline_mode<synchronous>, transform_indices = @transform_7, window_bounds = array<i64: 1, 16>}, {pipeline_mode = #tpu.pipeline_mode<synchronous>, transform_indices = @transform_8, window_bounds = array<i64: 1, 1>}, {transform_indices = @transform_9, window_bounds = array<i64: 1, 128>}]} {
    %c0 = arith.constant 0 : index
    %c0_0 = arith.constant 0 : index
    %0 = vector.load %arg1[%c0, %c0_0] : memref<128x60xf32, #tpu.memory_space<vmem>>, vector<128x60xf32>
    %1 = arith.truncf %0 : vector<128x60xf32> to vector<128x60xbf16>
    %c0_1 = arith.constant 0 : index
    %c0_2 = arith.constant 0 : index
    %2 = vector.load %arg2[%c0_1, %c0_2] : memref<60x64xbf16, #tpu.memory_space<vmem>>, vector<60x64xbf16>
    %cst = arith.constant dense<0.000000e+00> : vector<128x64xf32>
    %3 = tpu.matmul %1, %2, %cst {dimension_numbers = #tpu.dot_dimension_numbers<[1], [0], [0], [1], [0, 0, 1, 1], [], []>} : vector<128x60xbf16>, vector<60x64xbf16>, vector<128x64xf32> -> vector<128x64xf32>
    %c0_3 = arith.constant 0 : index
    %c0_4 = arith.constant 0 : index
    %4 = vector.load %arg3[%c0_3, %c0_4] : memref<1x64xf32, #tpu.memory_space<vmem>>, vector<1x64xf32>
    %5 = vector.broadcast %4 : vector<1x64xf32> to vector<128x64xf32>
    %6 = arith.addf %3, %5 : vector<128x64xf32>
    %cst_5 = arith.constant 0.000000e+00 : f32
    %7 = vector.broadcast %cst_5 : f32 to vector<128x64xf32>
    %8 = arith.maximumf %6, %7 : vector<128x64xf32>
    %9 = arith.truncf %8 : vector<128x64xf32> to vector<128x64xbf16>
    %c0_6 = arith.constant 0 : index
    %c0_7 = arith.constant 0 : index
    %10 = vector.load %arg4[%c0_6, %c0_7] : memref<64x32xbf16, #tpu.memory_space<vmem>>, vector<64x32xbf16>
    %cst_8 = arith.constant dense<0.000000e+00> : vector<128x32xf32>
    %11 = tpu.matmul %9, %10, %cst_8 {dimension_numbers = #tpu.dot_dimension_numbers<[1], [0], [0], [1], [0, 0, 1, 1], [], []>} : vector<128x64xbf16>, vector<64x32xbf16>, vector<128x32xf32> -> vector<128x32xf32>
    %c0_9 = arith.constant 0 : index
    %c0_10 = arith.constant 0 : index
    %12 = vector.load %arg5[%c0_9, %c0_10] : memref<1x32xf32, #tpu.memory_space<vmem>>, vector<1x32xf32>
    %13 = vector.broadcast %12 : vector<1x32xf32> to vector<128x32xf32>
    %14 = arith.addf %11, %13 : vector<128x32xf32>
    %cst_11 = arith.constant 0.000000e+00 : f32
    %15 = vector.broadcast %cst_11 : f32 to vector<128x32xf32>
    %16 = arith.maximumf %14, %15 : vector<128x32xf32>
    %17 = arith.truncf %16 : vector<128x32xf32> to vector<128x32xbf16>
    %c0_12 = arith.constant 0 : index
    %c0_13 = arith.constant 0 : index
    %18 = vector.load %arg6[%c0_12, %c0_13] : memref<32x16xbf16, #tpu.memory_space<vmem>>, vector<32x16xbf16>
    %cst_14 = arith.constant dense<0.000000e+00> : vector<128x16xf32>
    %19 = tpu.matmul %17, %18, %cst_14 {dimension_numbers = #tpu.dot_dimension_numbers<[1], [0], [0], [1], [0, 0, 1, 1], [], []>} : vector<128x32xbf16>, vector<32x16xbf16>, vector<128x16xf32> -> vector<128x16xf32>
    %c0_15 = arith.constant 0 : index
    %c0_16 = arith.constant 0 : index
    %20 = vector.load %arg7[%c0_15, %c0_16] : memref<1x16xf32, #tpu.memory_space<vmem>>, vector<1x16xf32>
    %21 = vector.broadcast %20 : vector<1x16xf32> to vector<128x16xf32>
    %22 = arith.addf %19, %21 : vector<128x16xf32>
    %cst_17 = arith.constant 0.000000e+00 : f32
    %23 = vector.broadcast %cst_17 : f32 to vector<128x16xf32>
    %24 = arith.maximumf %22, %23 : vector<128x16xf32>
    %25 = arith.truncf %24 : vector<128x16xf32> to vector<128x16xbf16>
    %c0_18 = arith.constant 0 : index
    %c0_19 = arith.constant 0 : index
    %26 = vector.load %arg8[%c0_18, %c0_19] : memref<1x16xbf16, #tpu.memory_space<vmem>>, vector<1x16xbf16>
    %cst_20 = arith.constant dense<0.000000e+00> : vector<1x128xf32>
    %27 = tpu.matmul %26, %25, %cst_20 {dimension_numbers = #tpu.dot_dimension_numbers<[1], [1], [0], [0], [0, 0, 1, 0], [], []>} : vector<1x16xbf16>, vector<128x16xbf16>, vector<1x128xf32> -> vector<1x128xf32>
    %c0_21 = arith.constant 0 : index
    %c0_22 = arith.constant 0 : index
    %28 = vector.load %arg9[%c0_21, %c0_22] : memref<1x1xf32, #tpu.memory_space<vmem>>, vector<1x1xf32>
    %29 = vector.broadcast %28 : vector<1x1xf32> to vector<1x128xf32>
    %30 = arith.addf %27, %29 : vector<1x128xf32>
    %31 = arith.negf %30 : vector<1x128xf32>
    %32 = math.exp %31 : vector<1x128xf32>
    %cst_23 = arith.constant 1.000000e+00 : f32
    %33 = vector.broadcast %cst_23 : f32 to vector<1x128xf32>
    %34 = arith.addf %33, %32 : vector<1x128xf32>
    %35 = arith.divf %33, %34 : vector<1x128xf32>
    %c0_24 = arith.constant 0 : index
    %c0_25 = arith.constant 0 : index
    %36 = vector.load %arg10[%c0_24, %c0_25] : memref<1x128xf32, #tpu.memory_space<vmem>>, vector<1x128xf32>
    tpu.vector_store %arg10[%c0_24, %c0_25], %35 {strides = array<i32>} : memref<1x128xf32, #tpu.memory_space<vmem>>, vector<1x128xf32>,
    return
  }
  func.func @transform_0(%arg0: i32) -> (i32, i32) {
    %c0_i32 = arith.constant 0 : i32
    %c0_i32_0 = arith.constant 0 : i32
    return %arg0, %c0_i32 : i32, i32
  }
  func.func @transform_1(%arg0: i32) -> (i32, i32) {
    %c0_i32 = arith.constant 0 : i32
    %c0_i32_0 = arith.constant 0 : i32
    %c0_i32_1 = arith.constant 0 : i32
    return %c0_i32, %c0_i32_0 : i32, i32
  }
  func.func @transform_2(%arg0: i32) -> (i32, i32) {
    %c0_i32 = arith.constant 0 : i32
    %c0_i32_0 = arith.constant 0 : i32
    %c0_i32_1 = arith.constant 0 : i32
    return %c0_i32, %c0_i32_0 : i32, i32
  }
  func.func @transform_3(%arg0: i32) -> (i32, i32) {
    %c0_i32 = arith.constant 0 : i32
    %c0_i32_0 = arith.constant 0 : i32
    %c0_i32_1 = arith.constant 0 : i32
    return %c0_i32, %c0_i32_0 : i32, i32
  }
  func.func @transform_4(%arg0: i32) -> (i32, i32) {
    %c0_i32 = arith.constant 0 : i32
    %c0_i32_0 = arith.constant 0 : i32
    %c0_i32_1 = arith.constant 0 : i32
    return %c0_i32, %c0_i32_0 : i32, i32
  }
  func.func @transform_5(%arg0: i32) -> (i32, i32) {
    %c0_i32 = arith.constant 0 : i32
    %c0_i32_0 = arith.constant 0 : i32
    %c0_i32_1 = arith.constant 0 : i32
    return %c0_i32, %c0_i32_0 : i32, i32
  }
  func.func @transform_6(%arg0: i32) -> (i32, i32) {
    %c0_i32 = arith.constant 0 : i32
    %c0_i32_0 = arith.constant 0 : i32
    %c0_i32_1 = arith.constant 0 : i32
    return %c0_i32, %c0_i32_0 : i32, i32
  }
  func.func @transform_7(%arg0: i32) -> (i32, i32) {
    %c0_i32 = arith.constant 0 : i32
    %c0_i32_0 = arith.constant 0 : i32
    %c0_i32_1 = arith.constant 0 : i32
    return %c0_i32, %c0_i32_0 : i32, i32
  }
  func.func @transform_8(%arg0: i32) -> (i32, i32) {
    %c0_i32 = arith.constant 0 : i32
    %c0_i32_0 = arith.constant 0 : i32
    %c0_i32_1 = arith.constant 0 : i32
    return %c0_i32, %c0_i32_0 : i32, i32
  }
  func.func @transform_9(%arg0: i32) -> (i32, i32) {
    %c0_i32 = arith.constant 0 : i32
    %c0_i32_0 = arith.constant 0 : i32
    return %c0_i32, %arg0 : i32, i32
  }
}

</mosaic_0001>

<bundles_post_ra>
// kernel: tpu_custom_call.1
= control target key start
LH: loop header
LB: loop body
LE: loop exit
PB: predicated region body
PF: predicated region fallthrough
CT: control target
= control target key end

     0   :  { %s851_s0 = inlined_call_operand.vmem [shape: f32[8,60], index: 0, kind: input, shape index: {}]   ;;  %s852_s1 = inlined_call_operand.vmem [shape: bf16[60,64], index: 1, kind: input, shape index: {}]   ;;  %s853_s2 = inlined_call_operand.vmem [shape: f32[1,64], index: 2, kind: input, shape index: {}]   ;;  %s854_s3 = inlined_call_operand.vmem [shape: bf16[64,32], index: 3, kind: input, shape index: {}]   ;;  %s855_s4 = inlined_call_operand.vmem [shape: f32[1,32], index: 4, kind: input, shape index: {}]   ;;  %s856_s5 = inlined_call_operand.vmem [shape: bf16[32,16], index: 5, kind: input, shape index: {}]   ;;  %s857_s6 = inlined_call_operand.vmem [shape: f32[1,16], index: 6, kind: input, shape index: {}]   ;;  %s858_s7 = inlined_call_operand.vmem [shape: bf16[1,16], index: 7, kind: input, shape index: {}]   ;;  %s859_s8 = inlined_call_operand.<no memory space> [shape: f32[1,1], index: 8, kind: input, shape index: {}]   ;;  %s860_s9 = inlined_call_operand.hbm [shape: f32[1,128], index: 9, kind: output, shape index: {}]  }
   0x1   :  { %v14_v0 = vstv %s859_s8 }
   0x2   :  { %15 = vst [vmem:[#allocation2] sm:$0x1] %v14_v0 }
   0x3   :  { %v548_v1 = vld [vmem:[%s852_s1 + $0x18] sm:$0xf]  ;;  %v603_v2 = vld [vmem:[%s852_s1 + $0x18] sm:$0x30]  ;;  %vm120_vm0 = vcmask 1045504   ;;  %v602_v5 = vld [vmem:[%s852_s1 + $0x10] sm:$0xff] }
   0x4   :  { %v549_v3 = vor.u32 %v603_v2, %v548_v1 }
   0x6   :  { %v122_v4 = vsel %vm120_vm0, %v549_v3, 0 }
   0x7   :  { %128 = vmatpush.bf16.msra.mxu0 %v122_v4 }
   0x8   :  { %16 = vsyncpa [#allocation4], 0  ;;  %v601_v6 = vld [vmem:[%s852_s1 + $0x8] sm:$0xff]  ;;  %v600_v7 = vld [vmem:[%s852_s1] sm:$0xff]  ;;  %vm95_vm1 = vcmask 490496   ;;  %vm233_vm2 = vcmask 523264  }
   0x9   :  { %v36_v8 = vld [vmem:[%s851_s0] sm:$0xff]  ;;  %v37_v9 = vld [vmem:[%s851_s0 + $0x8] sm:$0xff]  ;;  %v38_v11 = vld [vmem:[%s851_s0 + $0x10] sm:$0xff]  ;;  %vm351_vm3 = vcmask 261120   ;;  %vm457_vm4 = vcmask 130048   ;;  %s525_s23 = sshll.u32 %s860_s9, 4  ;;  %s526_s23 = int_to_ptr.hbm [resolvable:$true] %s525_s23 }
   0xa   :  { %v52_v10 = vpack.c.bf16 %v37_v9, %v36_v8  ;;  %v39_v12 = vld [vmem:[%s851_s0 + $0x18] sm:$0xff]  ;;  %v40_v14 = vld [vmem:[%s851_s0 + $0x20] sm:$0xff]  ;;  %v41_v15 = vld [vmem:[%s851_s0 + $0x28] sm:$0xff] }
   0xb   :  { %129 = vmatpush.bf16.msra.mxu0 %v602_v5  ;;  %v53_v13 = vpack.c.bf16 %v39_v12, %v38_v11  ;;  %v54_v16 = vpack.c.bf16 %v41_v15, %v40_v14  ;;  %v42_v17 = vld [vmem:[%s851_s0 + $0x30] sm:$0xff]  ;;  %v43_v18 = vld [vmem:[%s851_s0 + $0x38] sm:$0xff]  ;;  %v44_v20 = vld [vmem:[%s851_s0 + $0x40] sm:$0xff] }
   0xc   :  { %v55_v19 = vpack.c.bf16 %v43_v18, %v42_v17  ;;  %v45_v21 = vld [vmem:[%s851_s0 + $0x48] sm:$0xff]  ;;  %v46_v23 = vld [vmem:[%s851_s0 + $0x50] sm:$0xff]  ;;  %v47_v24 = vld [vmem:[%s851_s0 + $0x58] sm:$0xff] }
   0xd   :  { %v56_v22 = vpack.c.bf16 %v45_v21, %v44_v20  ;;  %v57_v25 = vpack.c.bf16 %v47_v24, %v46_v23  ;;  %v48_v26 = vld [vmem:[%s851_s0 + $0x60] sm:$0xff]  ;;  %v49_v27 = vld [vmem:[%s851_s0 + $0x68] sm:$0xff]  ;;  %v607_v28 = vld [vmem:[%s854_s3 + $0x18] sm:$0xff] }
   0xe   :  { %v58_v29 = vpack.c.bf16 %v49_v27, %v48_v26  ;;  %262 = vmatpush.bf16.msra.mxu1 %v607_v28  ;;  %v606_v30 = vld [vmem:[%s854_s3 + $0x10] sm:$0xff]  ;;  %v605_v31 = vld [vmem:[%s854_s3 + $0x8] sm:$0xff]  ;;  %v604_v32 = vld [vmem:[%s854_s3] sm:$0xff] }
   0xf   :  { %130 = vmatpush.bf16.msra.mxu0 %v601_v6  ;;  %v50_v33 = vld [vmem:[%s851_s0 + $0x70] sm:$0xff]  ;;  %v51_v34 = vld [vmem:[%s851_s0 + $0x78] sm:$0xff]  ;;  %v787_v37 = vld [vmem:[%s853_s2] ss:$0 sm:$0xff] }
  0x10   :  { %v59_v35 = vpack.c.bf16 %v51_v34, %v50_v33  ;;  %v609_v23 = vld [vmem:[%s856_s5 + $0x8] sm:$0xff]  ;;  %v608_v24 = vld [vmem:[%s856_s5] sm:$0xff] }
  0x11   :  { %382 = vmatpush.bf16.msra.mxu2 %v609_v23 }
  0x12   :  { %263 = vmatpush.bf16.msra.mxu1 %v606_v30 }
  0x13   :  { %131 = vmatpush.bf16.msra.mxu0 %v600_v7 }
  0x15   :  { %383 = vmatpush.bf16.msra.mxu2 %v608_v24 }
  0x16   :  { %550 = vmatmul.msk.bf16.vlgmr.msra.gmra.mxu0 %vm95_vm1, %v52_v10  ;;  %264 = vmatpush.bf16.msra.mxu1 %v605_v31 }
  0x1a   :  { %265 = vmatpush.bf16.msra.mxu1 %v604_v32  ;;  %v614_v32 = vld [vmem:[%s855_s4] ss:$0 sm:$0xff] }
  0x26   :  { %551 = vmatmul.msk.bf16.gmra.mxu0 %vm95_vm1, %v53_v13 }
  0x36   :  { %552 = vmatmul.msk.bf16.gmra.mxu0 %vm95_vm1, %v54_v16 }
  0x46   :  { %553 = vmatmul.msk.bf16.gmra.mxu0 %vm95_vm1, %v55_v19 }
  0x56   :  { %554 = vmatmul.msk.bf16.gmra.mxu0 %vm95_vm1, %v56_v22 }
  0x66   :  { %555 = vmatmul.msk.bf16.gmra.mxu0 %vm95_vm1, %v57_v25 }
  0x76   :  { %556 = vmatmul.msk.bf16.gmra.mxu0 %vm95_vm1, %v58_v29 }
  0x86   :  { %557 = vmatmul.msk.bf16.gmra.mxu0 %vm95_vm1, %v59_v35 }
  0x93   :  { %v133_v36 = vpop.f32.mrf.mxu0 }
  0x94   :  { %v134_v38 = vadd.f32 %v787_v37, %v133_v36 }
  0x96   :  { %v173_v41 = vmax.f32 %v134_v38, 0.0 }
  0x9b   :  { %v135_v39 = vpop.f32.mrf.mxu0 }
  0x9c   :  { %v136_v40 = vadd.f32 %v787_v37, %v135_v39 }
  0x9e   :  { %v174_v42 = vmax.f32 %v136_v40, 0.0 }
  0xa0   :  { %v189_v43 = vpack.c.bf16 %v174_v42, %v173_v41 }
  0xa2   :  { %574 = vmatmul.msk.bf16.vlgmr.msra.gmra.mxu1 %vm233_vm2, %v189_v43 }
  0xa3   :  { %v138_v44 = vpop.f32.mrf.mxu0 }
  0xa4   :  { %v139_v45 = vadd.f32 %v787_v37, %v138_v44 }
  0xa6   :  { %v175_v48 = vmax.f32 %v139_v45, 0.0 }
  0xab   :  { %v140_v46 = vpop.f32.mrf.mxu0 }
  0xac   :  { %v141_v47 = vadd.f32 %v787_v37, %v140_v46 }
  0xae   :  { %v176_v49 = vmax.f32 %v141_v47, 0.0 }
  0xb0   :  { %v190_v50 = vpack.c.bf16 %v176_v49, %v175_v48 }
  0xb2   :  { %575 = vmatmul.msk.bf16.gmra.mxu1 %vm233_vm2, %v190_v50 }
  0xb3   :  { %v143_v51 = vpop.f32.mrf.mxu0 }
  0xb4   :  { %v144_v52 = vadd.f32 %v787_v37, %v143_v51 }
  0xb6   :  { %v177_v55 = vmax.f32 %v144_v52, 0.0 }
  0xbb   :  { %v145_v53 = vpop.f32.mrf.mxu0 }
  0xbc   :  { %v146_v54 = vadd.f32 %v787_v37, %v145_v53 }
  0xbe   :  { %v178_v56 = vmax.f32 %v146_v54, 0.0 }
  0xc0   :  { %v191_v57 = vpack.c.bf16 %v178_v56, %v177_v55 }
  0xc2   :  { %576 = vmatmul.msk.bf16.gmra.mxu1 %vm233_vm2, %v191_v57 }
  0xc3   :  { %v148_v58 = vpop.f32.mrf.mxu0 }
  0xc4   :  { %v149_v59 = vadd.f32 %v787_v37, %v148_v58 }
  0xc6   :  { %v179_v62 = vmax.f32 %v149_v59, 0.0 }
  0xcb   :  { %v150_v60 = vpop.f32.mrf.mxu0 }
  0xcc   :  { %v151_v61 = vadd.f32 %v787_v37, %v150_v60 }
  0xce   :  { %v180_v63 = vmax.f32 %v151_v61, 0.0 }
  0xd0   :  { %v192_v0 = vpack.c.bf16 %v180_v63, %v179_v62 }
  0xd2   :  { %577 = vmatmul.msk.bf16.gmra.mxu1 %vm233_vm2, %v192_v0 }
  0xd3   :  { %v153_v1 = vpop.f32.mrf.mxu0 }
  0xd4   :  { %v154_v2 = vadd.f32 %v787_v37, %v153_v1 }
  0xd6   :  { %v181_v5 = vmax.f32 %v154_v2, 0.0 }
  0xdb   :  { %v155_v3 = vpop.f32.mrf.mxu0 }
  0xdc   :  { %v156_v4 = vadd.f32 %v787_v37, %v155_v3 }
  0xde   :  { %v182_v6 = vmax.f32 %v156_v4, 0.0 }
  0xe0   :  { %v193_v7 = vpack.c.bf16 %v182_v6, %v181_v5 }
  0xe2   :  { %578 = vmatmul.msk.bf16.gmra.mxu1 %vm233_vm2, %v193_v7 }
  0xe3   :  { %v158_v8 = vpop.f32.mrf.mxu0 }
  0xe4   :  { %v159_v9 = vadd.f32 %v787_v37, %v158_v8 }
  0xe6   :  { %v183_v12 = vmax.f32 %v159_v9, 0.0 }
  0xeb   :  { %v160_v10 = vpop.f32.mrf.mxu0 }
  0xec   :  { %v161_v11 = vadd.f32 %v787_v37, %v160_v10 }
  0xee   :  { %v184_v13 = vmax.f32 %v161_v11, 0.0 }
  0xf0   :  { %v194_v14 = vpack.c.bf16 %v184_v13, %v183_v12 }
  0xf2   :  { %579 = vmatmul.msk.bf16.gmra.mxu1 %vm233_vm2, %v194_v14 }
  0xf3   :  { %v163_v15 = vpop.f32.mrf.mxu0 }
  0xf4   :  { %v164_v16 = vadd.f32 %v787_v37, %v163_v15 }
  0xf6   :  { %v185_v19 = vmax.f32 %v164_v16, 0.0 }
  0xfb   :  { %v165_v17 = vpop.f32.mrf.mxu0 }
  0xfc   :  { %v166_v18 = vadd.f32 %v787_v37, %v165_v17 }
  0xfe   :  { %v186_v20 = vmax.f32 %v166_v18, 0.0 }
 0x100   :  { %v195_v21 = vpack.c.bf16 %v186_v20, %v185_v19 }
 0x102   :  { %580 = vmatmul.msk.bf16.gmra.mxu1 %vm233_vm2, %v195_v21 }
 0x103   :  { %v168_v22 = vpop.f32.mrf.mxu0 }
 0x104   :  { %v169_v25 = vadd.f32 %v787_v37, %v168_v22 }
 0x106   :  { %v187_v28 = vmax.f32 %v169_v25, 0.0  ;;  %v615_v25 = vld [vmem:[%s857_s6] ss:$0 sm:$0xff] }
 0x10b   :  { %v170_v26 = vpop.f32.mrf.mxu0 }
 0x10c   :  { %v171_v27 = vadd.f32 %v787_v37, %v170_v26 }
 0x10e   :  { %v188_v29 = vmax.f32 %v171_v27, 0.0 }
 0x110   :  { %v196_v30 = vpack.c.bf16 %v188_v29, %v187_v28 }
 0x112   :  { %581 = vmatmul.msk.bf16.gmra.mxu1 %vm233_vm2, %v196_v30 }
 0x11f   :  { %v267_v31 = vpop.f32.mrf.mxu1 }
 0x120   :  { %v268_v33 = vadd.f32 %v614_v32, %v267_v31 }
 0x122   :  { %v307_v36 = vmax.f32 %v268_v33, 0.0 }
 0x127   :  { %v269_v34 = vpop.f32.mrf.mxu1 }
 0x128   :  { %v270_v35 = vadd.f32 %v614_v32, %v269_v34 }
 0x12a   :  { %v308_v38 = vmax.f32 %v270_v35, 0.0 }
 0x12c   :  { %v323_v39 = vpack.c.bf16 %v308_v38, %v307_v36 }
 0x12e   :  { %590 = vmatmul.msk.bf16.vlgmr.msra.gmra.mxu2 %vm351_vm3, %v323_v39 }
 0x12f   :  { %v272_v37 = vpop.f32.mrf.mxu1 }
 0x130   :  { %v273_v40 = vadd.f32 %v614_v32, %v272_v37 }
 0x132   :  { %v309_v43 = vmax.f32 %v273_v40, 0.0 }
 0x137   :  { %v274_v41 = vpop.f32.mrf.mxu1 }
 0x138   :  { %v275_v42 = vadd.f32 %v614_v32, %v274_v41 }
 0x13a   :  { %v310_v44 = vmax.f32 %v275_v42, 0.0 }
 0x13c   :  { %v324_v45 = vpack.c.bf16 %v310_v44, %v309_v43 }
 0x13e   :  { %591 = vmatmul.msk.bf16.gmra.mxu2 %vm351_vm3, %v324_v45 }
 0x13f   :  { %v277_v46 = vpop.f32.mrf.mxu1 }
 0x140   :  { %v278_v47 = vadd.f32 %v614_v32, %v277_v46 }
 0x142   :  { %v311_v50 = vmax.f32 %v278_v47, 0.0 }
 0x147   :  { %v279_v48 = vpop.f32.mrf.mxu1 }
 0x148   :  { %v280_v49 = vadd.f32 %v614_v32, %v279_v48 }
 0x14a   :  { %v312_v51 = vmax.f32 %v280_v49, 0.0 }
 0x14c   :  { %v325_v52 = vpack.c.bf16 %v312_v51, %v311_v50 }
 0x14e   :  { %592 = vmatmul.msk.bf16.gmra.mxu2 %vm351_vm3, %v325_v52 }
 0x14f   :  { %v282_v53 = vpop.f32.mrf.mxu1 }
 0x150   :  { %v283_v54 = vadd.f32 %v614_v32, %v282_v53 }
 0x152   :  { %v313_v57 = vmax.f32 %v283_v54, 0.0 }
 0x157   :  { %v284_v55 = vpop.f32.mrf.mxu1 }
 0x158   :  { %v285_v56 = vadd.f32 %v614_v32, %v284_v55 }
 0x15a   :  { %v314_v58 = vmax.f32 %v285_v56, 0.0 }
 0x15c   :  { %v326_v59 = vpack.c.bf16 %v314_v58, %v313_v57 }
 0x15e   :  { %593 = vmatmul.msk.bf16.gmra.mxu2 %vm351_vm3, %v326_v59 }
 0x15f   :  { %v287_v60 = vpop.f32.mrf.mxu1 }
 0x160   :  { %v288_v61 = vadd.f32 %v614_v32, %v287_v60 }
 0x162   :  { %v315_v0 = vmax.f32 %v288_v61, 0.0 }
 0x167   :  { %v289_v62 = vpop.f32.mrf.mxu1 }
 0x168   :  { %v290_v63 = vadd.f32 %v614_v32, %v289_v62 }
 0x16a   :  { %v316_v1 = vmax.f32 %v290_v63, 0.0 }
 0x16c   :  { %v327_v2 = vpack.c.bf16 %v316_v1, %v315_v0 }
 0x16e   :  { %594 = vmatmul.msk.bf16.gmra.mxu2 %vm351_vm3, %v327_v2 }
 0x16f   :  { %v292_v3 = vpop.f32.mrf.mxu1 }
 0x170   :  { %v293_v4 = vadd.f32 %v614_v32, %v292_v3 }
 0x172   :  { %v317_v7 = vmax.f32 %v293_v4, 0.0 }
 0x177   :  { %v294_v5 = vpop.f32.mrf.mxu1 }
 0x178   :  { %v295_v6 = vadd.f32 %v614_v32, %v294_v5 }
 0x17a   :  { %v318_v8 = vmax.f32 %v295_v6, 0.0 }
 0x17c   :  { %v328_v9 = vpack.c.bf16 %v318_v8, %v317_v7 }
 0x17e   :  { %595 = vmatmul.msk.bf16.gmra.mxu2 %vm351_vm3, %v328_v9 }
 0x17f   :  { %v297_v10 = vpop.f32.mrf.mxu1 }
 0x180   :  { %v298_v11 = vadd.f32 %v614_v32, %v297_v10 }
 0x182   :  { %v319_v14 = vmax.f32 %v298_v11, 0.0 }
 0x187   :  { %v299_v12 = vpop.f32.mrf.mxu1 }
 0x188   :  { %v300_v13 = vadd.f32 %v614_v32, %v299_v12 }
 0x18a   :  { %v320_v15 = vmax.f32 %v300_v13, 0.0 }
 0x18c   :  { %v329_v16 = vpack.c.bf16 %v320_v15, %v319_v14 }
 0x18e   :  { %596 = vmatmul.msk.bf16.gmra.mxu2 %vm351_vm3, %v329_v16 }
 0x18f   :  { %v302_v17 = vpop.f32.mrf.mxu1 }
 0x190   :  { %v303_v18 = vadd.f32 %v614_v32, %v302_v17 }
 0x192   :  { %v321_v21 = vmax.f32 %v303_v18, 0.0 }
 0x197   :  { %v304_v19 = vpop.f32.mrf.mxu1 }
 0x198   :  { %v305_v20 = vadd.f32 %v614_v32, %v304_v19 }
 0x19a   :  { %v322_v22 = vmax.f32 %v305_v20, 0.0 }
 0x19c   :  { %v330_v23 = vpack.c.bf16 %v322_v22, %v321_v21  ;;  %v450_v22 = vld [vmem:[#allocation2] sm:$0x1] }
 0x19e   :  { %597 = vmatmul.msk.bf16.gmra.mxu2 %vm351_vm3, %v330_v23  ;;  %v646_v23 = vmov 0  }
 0x19f   :  { %612 = vset.pattern.permute.xlu0 %v646_v23 }
 0x1a0   :  { %453 = vperm.xlu0 %612, %v450_v22  }
 0x1b1   :  { %v385_v24 = vpop.f32.mrf.mxu2 }
 0x1b2   :  { %v386_v26 = vadd.f32 %v615_v25, %v385_v24 }
 0x1b4   :  { %v425_v29 = vmax.f32 %v386_v26, 0.0 }
 0x1b9   :  { %v387_v27 = vpop.f32.mrf.mxu2 }
 0x1ba   :  { %v388_v28 = vadd.f32 %v615_v25, %v387_v27  ;;  %v449_v27 = vld [vmem:[%s858_s7] sm:$0x1]  ;;  %s647_s7 = smov [#allocation3]  }
 0x1bb   :  { %s523_s20 = sshll.u32 %s647_s7, 4  ;;  %s524_s20 = int_to_ptr.vmem [resolvable:$true] %s523_s20 }
 0x1bc   :  { %v426_v30 = vmax.f32 %v388_v28, 0.0 }
 0x1be   :  { %v833_v31 = vpack.c.bf16 %v426_v30, %v425_v29 }
 0x1c0   :  { %v462_v26 = vsel %vm457_vm4, %v833_v31, 0 }
 0x1c1   :  { %v390_v33 = vpop.f32.mrf.mxu2 }
 0x1c2   :  { %v391_v34 = vadd.f32 %v615_v25, %v390_v33 }
 0x1c4   :  { %v427_v36 = vmax.f32 %v391_v34, 0.0 }
 0x1c9   :  { %v392_v32 = vpop.f32.mrf.mxu2 }
 0x1ca   :  { %v393_v35 = vadd.f32 %v615_v25, %v392_v32 }
 0x1cc   :  { %v428_v38 = vmax.f32 %v393_v35, 0.0 }
 0x1ce   :  { %v442_v39 = vpack.c.bf16 %v428_v38, %v427_v36 }
 0x1d1   :  { %v395_v37 = vpop.f32.mrf.mxu2 }
 0x1d2   :  { %v396_v40 = vadd.f32 %v615_v25, %v395_v37 }
 0x1d4   :  { %v429_v43 = vmax.f32 %v396_v40, 0.0 }
 0x1d9   :  { %v397_v41 = vpop.f32.mrf.mxu2 }
 0x1da   :  { %v398_v42 = vadd.f32 %v615_v25, %v397_v41 }
 0x1dc   :  { %v430_v44 = vmax.f32 %v398_v42, 0.0 }
 0x1de   :  { %v443_v45 = vpack.c.bf16 %v430_v44, %v429_v43 }
 0x1e0   :  { %v468_v24 = vsel %vm457_vm4, %v443_v45, 0 }
 0x1e1   :  { %v400_v46 = vpop.f32.mrf.mxu2 }
 0x1e2   :  { %v401_v47 = vadd.f32 %v615_v25, %v400_v46 }
 0x1e4   :  { %v431_v50 = vmax.f32 %v401_v47, 0.0 }
 0x1e9   :  { %v402_v48 = vpop.f32.mrf.mxu2 }
 0x1ea   :  { %v403_v49 = vadd.f32 %v615_v25, %v402_v48 }
 0x1ec   :  { %v432_v51 = vmax.f32 %v403_v49, 0.0 }
 0x1ee   :  { %v444_v52 = vpack.c.bf16 %v432_v51, %v431_v50 }
 0x1f0   :  { %v471_v21 = vsel %vm457_vm4, %v444_v52, 0 }
 0x1f1   :  { %v405_v53 = vpop.f32.mrf.mxu2 }
 0x1f2   :  { %v406_v54 = vadd.f32 %v615_v25, %v405_v53 }
 0x1f4   :  { %v433_v57 = vmax.f32 %v406_v54, 0.0 }
 0x1f9   :  { %v407_v55 = vpop.f32.mrf.mxu2 }
 0x1fa   :  { %v408_v56 = vadd.f32 %v615_v25, %v407_v55 }
 0x1fc   :  { %v434_v58 = vmax.f32 %v408_v56, 0.0 }
 0x1fe   :  { %v445_v59 = vpack.c.bf16 %v434_v58, %v433_v57 }
 0x200   :  { %v474_v20 = vsel %vm457_vm4, %v445_v59, 0 }
 0x201   :  { %v410_v60 = vpop.f32.mrf.mxu2 }
 0x202   :  { %v411_v14 = vadd.f32 %v615_v25, %v410_v60 }
 0x204   :  { %v435_v17 = vmax.f32 %v411_v14, 0.0 }
 0x209   :  { %v412_v61 = vpop.f32.mrf.mxu2 }
 0x20a   :  { %v413_v12 = vadd.f32 %v615_v25, %v412_v61 }
 0x20c   :  { %v436_v15 = vmax.f32 %v413_v12, 0.0 }
 0x20e   :  { %v446_v18 = vpack.c.bf16 %v436_v15, %v435_v17 }
 0x210   :  { %v477_v19 = vsel %vm457_vm4, %v446_v18, 0 }
 0x211   :  { %v415_v62 = vpop.f32.mrf.mxu2 }
 0x212   :  { %v416_v7 = vadd.f32 %v615_v25, %v415_v62  ;;  %v454_v28 = vpop.permute.xlu0 %453 }
 0x213   :  { %v456_v29 = vperm.slane %v454_v28, 0 }
 0x214   :  { %v437_v11 = vmax.f32 %v416_v7, 0.0 }
 0x219   :  { %v417_v63 = vpop.f32.mrf.mxu2 }
 0x21a   :  { %v418_v4 = vadd.f32 %v615_v25, %v417_v63 }
 0x21c   :  { %v438_v9 = vmax.f32 %v418_v4, 0.0 }
 0x21e   :  { %v447_v13 = vpack.c.bf16 %v438_v9, %v437_v11 }
 0x220   :  { %v480_v16 = vsel %vm457_vm4, %v447_v13, 0 }
 0x221   :  { %v420_v0 = vpop.f32.mrf.mxu2 }
 0x222   :  { %v421_v1 = vadd.f32 %v615_v25, %v420_v0 }
 0x224   :  { %v439_v5 = vmax.f32 %v421_v1, 0.0 }
 0x229   :  { %v422_v2 = vpop.f32.mrf.mxu2 }
 0x22a   :  { %v423_v3 = vadd.f32 %v615_v25, %v422_v2  ;;  %v465_v25 = vsel %vm457_vm4, %v442_v39, 0 }
 0x22c   :  { %v440_v6 = vmax.f32 %v423_v3, 0.0 }
 0x22e   :  { %v448_v8 = vpack.c.bf16 %v440_v6, %v439_v5 }
 0x230   :  { %v483_v10 = vsel %vm457_vm4, %v448_v8, 0 }
 0x231   :  { %485 = vmatpush.bf16.xpose.msra.mxu3 %v483_v10 }
 0x239   :  { %486 = vmatpush.bf16.xpose.msra.mxu3 %v480_v16 }
 0x241   :  { %487 = vmatpush.bf16.xpose.msra.mxu3 %v477_v19 }
 0x249   :  { %488 = vmatpush.bf16.xpose.msra.mxu3 %v474_v20 }
 0x251   :  { %489 = vmatpush.bf16.xpose.msra.mxu3 %v471_v21 }
 0x259   :  { %490 = vmatpush.bf16.xpose.msra.mxu3 %v468_v24 }
 0x261   :  { %491 = vmatpush.bf16.xpose.msra.mxu3 %v465_v25 }
 0x269   :  { %492 = vmatpush.bf16.xpose.msra.mxu3 %v462_v26 }
 0x270   :  { %598 = vmatmul.msk.bf16.vlgmr.msra.gmra.mxu3 %vm457_vm4, %v449_v27 }
 0x2f3   :  { %v494_v30 = vpop.f32.mrf.mxu3 }
 0x2f4   :  { %v495_v33 = vadd.f32 %v494_v30, %v456_v29 }
 0x2f6   :  { %v599_v34 = vmul.f32 -1.442695, %v495_v33 }
 0x2f8   :  { %616 = vpow2.f32 %v599_v34 }
 0x2fb   :  { %v496_v32 = vpop.f32.mrf.mxu3 }
 0x2fe   :  { %v617_v35 = vpop.eup %616 }
 0x2ff   :  { %v501_v36 = vadd.f32 1.0, %v617_v35 }
 0x301   :  { %618 = vrcp.f32 %v501_v36  ;;  %v513_v37 = vand.u32 2147483648, %v501_v36  ;;  %v511_v41 = vand.u32 2147483647, %v501_v36  ;;  %vm507_vm6 = vweird.f32 %v501_v36 }
 0x303   :  { %v514_v43 = vor.u32 1.1754944e-38, %v513_v37  ;;  %vm512_vm8 = vcmp.eq.f32.partialorder %v511_v41, 8.507059e+37 }
 0x307   :  { %v619_v38 = vpop.eup %618 }
 0x308   :  { %v503_v39 = vmul.f32 %v619_v38, %v501_v36  ;;  %vm508_vm5 = vweird.f32 %v619_v38 }
 0x309   :  { %vm509_vm7 = vmor %vm507_vm6, %vm508_vm5 }
 0x30a   :  { %v504_v31 = vsub.f32 1.0, %v503_v39 }
 0x30c   :  { %v505_v40 = vmul.f32 %v619_v38, %v504_v31 }
 0x30e   :  { %v506_v42 = vadd.f32 %v619_v38, %v505_v40 }
 0x310   :  { %v510_v44 = vsel %vm509_vm7, %v619_v38, %v506_v42 }
 0x311   :  { %v515_v45 = vsel %vm512_vm8, %v514_v43, %v510_v44 }
 0x312   :  { %517 = vst [vmem:[#allocation3] sm:$0x1] %v515_v45 }
 0x313   :  { %528 = dma.vmem_to_hbm [thread:$0]  %s524_s20, 16, %s526_s23, [#allocation4]  }
 0x314   :  { %644 = dma.done.wait [#allocation4], 16  }
 0x315   :  { %645 = vsyncadd [#allocation4], 4294967280 }
 0x316   :  { %533 = vsyncpa [#allocation4], 1 }

</bundles_post_ra>
